<compile_context>
chip_gen: v7x
topology: tpu7x:2x2x1
jax: 0.10.0
libtpu: 0.0.40
codegen_flags: <defaults>
</compile_context>

<pallas_src>
import jax
import jax.numpy as jnp
from jax.experimental import pallas as pl
from jax.experimental.pallas import tpu as pltpu


LANE = 128
NEG_BIG = -1e30  # finite "minus infinity" for padded softmax lanes (avoids inf-inf NaNs)


def _round_up(x, m):
    return (x + m - 1) // m * m


def mlp_kernel(x_ref, w1_ref, b1_ref, w2_ref, b2_ref, w3_ref, b3_ref, o_ref):
    # x arrives as bf16 (cast at the call boundary); biases / elementwise in f32.
    x = x_ref[...]

    # fc1 + ReLU
    h1 = jnp.dot(x, w1_ref[...], preferred_element_type=jnp.float32) + b1_ref[...]
    h1 = jnp.maximum(h1, 0.0)

    # fc2 + ReLU
    h2 = jnp.dot(h1.astype(jnp.bfloat16), w2_ref[...],
                 preferred_element_type=jnp.float32) + b2_ref[...]
    h2 = jnp.maximum(h2, 0.0)

    # fc3 (lane-padded width); padded lanes carry b3 = -1e30 so exp() vanishes there.
    logits = jnp.dot(h2.astype(jnp.bfloat16), w3_ref[...],
                     preferred_element_type=jnp.float32) + b3_ref[...]

    # Numerically stable softmax over the padded width; reciprocal on the EUP.
    m = jnp.max(logits, axis=-1, keepdims=True)
    e = jnp.exp(logits - m)
    denom = jnp.sum(e, axis=-1, keepdims=True)
    probs = e * pl.reciprocal(denom, approx=True)

    # Store only the real classes (narrow but tiny masked store; saves ~60x HBM write).
    o_ref[...] = probs[:, : o_ref.shape[-1]].astype(o_ref.dtype)


def prepare_params(params):
    """One-time padding / casting of the weights (hoisted out of the forward call)."""
    w1, b1, w2, b2, w3, b3 = params
    input_dim, hidden_dim = w1.shape
    out_dim = w3.shape[1]
    hid_p = _round_up(hidden_dim, LANE)
    out_p = _round_up(out_dim, LANE)

    def pad2(a, rows, cols, dtype, fill=0.0):
        return jnp.pad(
            a, ((0, rows - a.shape[0]), (0, cols - a.shape[1])),
            constant_values=fill,
        ).astype(dtype)

    # Weights in bf16 (MXU operands, half the DMA/VMEM bytes); biases stay f32.
    # w1 keeps its real K rows (x is unpadded); only output dims are lane-padded.
    w1_p = pad2(w1, input_dim, hid_p, jnp.bfloat16)
    w2_p = pad2(w2, hid_p, hid_p, jnp.bfloat16)
    w3_p = pad2(w3, hid_p, out_p, jnp.bfloat16)
    b1_p = pad2(b1, 1, hid_p, jnp.float32)
    b2_p = pad2(b2, 1, hid_p, jnp.float32)
    # Bake the output-lane mask into b3: padded lanes get a huge negative bias.
    b3_p = pad2(b3, 1, out_p, jnp.float32, fill=NEG_BIG)
    return (w1_p, b1_p, w2_p, b2_p, w3_p, b3_p), out_dim


def mlp_forward(x, prepared, *, tile_b=None):
    """x: [batch, input_dim] f32; prepared: output of prepare_params()[0]."""
    w1_p, b1_p, w2_p, b2_p, w3_p, b3_p = prepared
    batch, input_dim = x.shape
    hid_p = w1_p.shape[1]
    out_p = w3_p.shape[1]
    out_dim = b3_p.shape  # placeholder (real out_dim passed via out_shape below)

    # out_dim is whatever the caller's padded b3 encodes as "real" lanes; recover
    # it from the unpadded head we store in the output shape instead:
    # (simpler: caller passes it — here we derive it from w3_p's real columns)
    # We instead take it from the non -1e30 lanes of b3_p at trace time is not
    # possible, so require it explicitly:
    raise_if = None  # (kept simple; see mlp_apply below)


def mlp_apply(x, prepared, out_dim, *, tile_b=None):
    """x: [batch, input_dim] f32; prepared: padded/cast params; out_dim: real classes."""
    w1_p, b1_p, w2_p, b2_p, w3_p, b3_p = prepared
    batch, input_dim = x.shape
    hid_p = w1_p.shape[1]
    out_p = w3_p.shape[1]

    if tile_b is None:
        # ~2 balanced grid steps (keeps both v7x TCs busy; negligible cost on 1-TC
        # chips), sublane-aligned, capped so per-step VMEM stays tiny.
        tile_b = min(2048, _round_up(pl.cdiv(batch, 2), 16))
    batch_p = _round_up(batch, tile_b)
    grid = (batch_p // tile_b,)

    # Feed x as bf16 (halves the dominant HBM->VMEM DMA); pad batch rows only if needed.
    x_bf = x.astype(jnp.bfloat16)
    if batch_p != batch:
        x_bf = jnp.pad(x_bf, ((0, batch_p - batch), (0, 0)))

    resident = lambda a: pl.BlockSpec(a.shape, lambda i: (0, 0))

    flops = 2 * batch_p * (input_dim * hid_p + hid_p * hid_p + hid_p * out_p)
    bytes_accessed = (
        batch_p * input_dim * 2                              # x (bf16)
        + (w1_p.size + w2_p.size + w3_p.size) * 2            # weights (bf16)
        + (b1_p.size + b2_p.size + b3_p.size) * 4            # biases (f32)
        + batch_p * out_dim * 4                              # output (f32, real width)
    )
    cost = pl.CostEstimate(
        flops=flops,
        transcendentals=batch_p * out_p,   # exp in softmax
        bytes_accessed=bytes_accessed,
    )

    out = pl.pallas_call(
        mlp_kernel,
        out_shape=jax.ShapeDtypeStruct((batch_p, out_dim), jnp.float32),
        grid=grid,
        in_specs=[
            # Block last dim == full array dim (legal without lane padding).
            pl.BlockSpec((tile_b, input_dim), lambda i: (i, 0)),
            resident(w1_p), resident(b1_p),
            resident(w2_p), resident(b2_p),
            resident(w3_p), resident(b3_p),
        ],
        out_specs=pl.BlockSpec((tile_b, out_dim), lambda i: (i, 0)),
        compiler_params=pltpu.CompilerParams(
            dimension_semantics=("parallel",),
        ),
        cost_estimate=cost,
    )(x_bf, w1_p, b1_p, w2_p, b2_p, w3_p, b3_p)

    return out if batch_p == batch else out[:batch]


def init_params(key, input_dim, hidden_dim, output_dim):
    """Deterministic init mimicking nn.Linear default (uniform +/- 1/sqrt(fan_in))."""
    def linear(k, fan_in, fan_out):
        kw, kb = jax.random.split(k)
        bound = 1.0 / jnp.sqrt(jnp.float32(fan_in))
        # stored as [in, out] for x @ W  (== PyTorch x @ W.T with W [out, in])
        w = jax.random.uniform(kw, (fan_in, fan_out), jnp.float32, -bound, bound)
        b = jax.random.uniform(kb, (1, fan_out), jnp.float32, -bound, bound)
        return w, b

    k1, k2, k3 = jax.random.split(key, 3)
    w1, b1 = linear(k1, input_dim, hidden_dim)
    w2, b2 = linear(k2, hidden_dim, hidden_dim)
    w3, b3 = linear(k3, hidden_dim, output_dim)
    return (w1, b1, w2, b2, w3, b3)


def mlp_reference(x, params):
    """Pure-JAX reference matching the kernel's bf16-matmul / f32-elementwise recipe."""
    w1, b1, w2, b2, w3, b3 = params
    bf = jnp.bfloat16
    h = jnp.maximum(
        jnp.dot(x.astype(bf), w1.astype(bf), preferred_element_type=jnp.float32) + b1, 0.0)
    h = jnp.maximum(
        jnp.dot(h.astype(bf), w2.astype(bf), preferred_element_type=jnp.float32) + b2, 0.0)
    logits = jnp.dot(h.astype(bf), w3.astype(bf),
                     preferred_element_type=jnp.float32) + b3
    return jax.nn.softmax(logits, axis=-1)


if __name__ == "__main__":
    batch = 512          # -> tile_b=256, grid=(2,): balanced across v7x's 2 TCs
    input_dim = 32
    hidden_dim = 64
    output_dim = 4

    key = jax.random.PRNGKey(0)
    kx, kp = jax.random.split(key)
    x = jax.random.normal(kx, (batch, input_dim), jnp.float32)
    params = init_params(kp, input_dim, hidden_dim, output_dim)

    # One-time weight preparation (padding + bf16 cast) outside the forward call.
    prepared, out_dim = prepare_params(params)

    fwd = jax.jit(lambda xx, pp: mlp_apply(xx, pp, out_dim))
    out = jax.block_until_ready(fwd(x, prepared))

    ref = mlp_reference(x, params)
    assert out.shape == (batch, output_dim)
    # Tolerances cover bf16 matmul operands + approx reciprocal in the softmax.
    assert jnp.allclose(out, ref, atol=2e-3, rtol=2e-3), "mismatch vs reference"
    assert jnp.allclose(jnp.sum(out, axis=-1), 1.0, atol=2e-3), "softmax rows must sum to 1"

    print("KERNEL_OK")
</pallas_src>

<mosaic_0001>
module attributes {stable_mosaic.version = 11 : i64} {
  func.func @mlp_kernel(%arg0: i32, %arg1: memref<256x32xbf16, #tpu.memory_space<vmem>>, %arg2: memref<32x128xbf16, #tpu.memory_space<vmem>>, %arg3: memref<1x128xf32, #tpu.memory_space<vmem>>, %arg4: memref<128x128xbf16, #tpu.memory_space<vmem>>, %arg5: memref<1x128xf32, #tpu.memory_space<vmem>>, %arg6: memref<128x128xbf16, #tpu.memory_space<vmem>>, %arg7: memref<1x128xf32, #tpu.memory_space<vmem>>, %arg8: memref<256x4xf32, #tpu.memory_space<vmem>>) attributes {dimension_semantics = [#tpu.dimension_semantics<parallel>], iteration_bounds = array<i64: 2>, scalar_prefetch = 0 : i64, scratch_operands = 0 : i64, tpu.core_type = #tpu.core_type<tc>, window_params = [{transform_indices = @transform_0, window_bounds = array<i64: 256, 32>}, {pipeline_mode = #tpu.pipeline_mode<synchronous>, transform_indices = @transform_1, window_bounds = array<i64: 32, 128>}, {pipeline_mode = #tpu.pipeline_mode<synchronous>, transform_indices = @transform_2, window_bounds = array<i64: 1, 128>}, {pipeline_mode = #tpu.pipeline_mode<synchronous>, transform_indices = @transform_3, window_bounds = array<i64: 128, 128>}, {pipeline_mode = #tpu.pipeline_mode<synchronous>, transform_indices = @transform_4, window_bounds = array<i64: 1, 128>}, {pipeline_mode = #tpu.pipeline_mode<synchronous>, transform_indices = @transform_5, window_bounds = array<i64: 128, 128>}, {pipeline_mode = #tpu.pipeline_mode<synchronous>, transform_indices = @transform_6, window_bounds = array<i64: 1, 128>}, {transform_indices = @transform_7, window_bounds = array<i64: 256, 4>}]} {
    %c0 = arith.constant 0 : index
    %c0_0 = arith.constant 0 : index
    %0 = vector.load %arg1[%c0, %c0_0] : memref<256x32xbf16, #tpu.memory_space<vmem>>, vector<256x32xbf16>
    %c0_1 = arith.constant 0 : index
    %c0_2 = arith.constant 0 : index
    %1 = vector.load %arg2[%c0_1, %c0_2] : memref<32x128xbf16, #tpu.memory_space<vmem>>, vector<32x128xbf16>
    %cst = arith.constant dense<0.000000e+00> : vector<256x128xf32>
    %2 = tpu.matmul %0, %1, %cst {dimension_numbers = #tpu.dot_dimension_numbers<[1], [0], [0], [1], [0, 0, 1, 1], [], []>} : vector<256x32xbf16>, vector<32x128xbf16>, vector<256x128xf32> -> vector<256x128xf32>
    %c0_3 = arith.constant 0 : index
    %c0_4 = arith.constant 0 : index
    %3 = vector.load %arg3[%c0_3, %c0_4] : memref<1x128xf32, #tpu.memory_space<vmem>>, vector<1x128xf32>
    %4 = vector.broadcast %3 : vector<1x128xf32> to vector<256x128xf32>
    %5 = arith.addf %2, %4 : vector<256x128xf32>
    %cst_5 = arith.constant 0.000000e+00 : f32
    %6 = vector.broadcast %cst_5 : f32 to vector<256x128xf32>
    %7 = arith.maximumf %5, %6 : vector<256x128xf32>
    %8 = arith.truncf %7 : vector<256x128xf32> to vector<256x128xbf16>
    %c0_6 = arith.constant 0 : index
    %c0_7 = arith.constant 0 : index
    %9 = vector.load %arg4[%c0_6, %c0_7] : memref<128x128xbf16, #tpu.memory_space<vmem>>, vector<128x128xbf16>
    %cst_8 = arith.constant dense<0.000000e+00> : vector<256x128xf32>
    %10 = tpu.matmul %8, %9, %cst_8 {dimension_numbers = #tpu.dot_dimension_numbers<[1], [0], [0], [1], [0, 0, 1, 1], [], []>} : vector<256x128xbf16>, vector<128x128xbf16>, vector<256x128xf32> -> vector<256x128xf32>
    %c0_9 = arith.constant 0 : index
    %c0_10 = arith.constant 0 : index
    %11 = vector.load %arg5[%c0_9, %c0_10] : memref<1x128xf32, #tpu.memory_space<vmem>>, vector<1x128xf32>
    %12 = vector.broadcast %11 : vector<1x128xf32> to vector<256x128xf32>
    %13 = arith.addf %10, %12 : vector<256x128xf32>
    %cst_11 = arith.constant 0.000000e+00 : f32
    %14 = vector.broadcast %cst_11 : f32 to vector<256x128xf32>
    %15 = arith.maximumf %13, %14 : vector<256x128xf32>
    %16 = arith.truncf %15 : vector<256x128xf32> to vector<256x128xbf16>
    %c0_12 = arith.constant 0 : index
    %c0_13 = arith.constant 0 : index
    %17 = vector.load %arg6[%c0_12, %c0_13] : memref<128x128xbf16, #tpu.memory_space<vmem>>, vector<128x128xbf16>
    %cst_14 = arith.constant dense<0.000000e+00> : vector<256x128xf32>
    %18 = tpu.matmul %16, %17, %cst_14 {dimension_numbers = #tpu.dot_dimension_numbers<[1], [0], [0], [1], [0, 0, 1, 1], [], []>} : vector<256x128xbf16>, vector<128x128xbf16>, vector<256x128xf32> -> vector<256x128xf32>
    %c0_15 = arith.constant 0 : index
    %c0_16 = arith.constant 0 : index
    %19 = vector.load %arg7[%c0_15, %c0_16] : memref<1x128xf32, #tpu.memory_space<vmem>>, vector<1x128xf32>
    %20 = vector.broadcast %19 : vector<1x128xf32> to vector<256x128xf32>
    %21 = arith.addf %18, %20 : vector<256x128xf32>
    %cst_17 = arith.constant dense<0xFF800000> : vector<256xf32>
    %22 = vector.multi_reduction <maximumf>, %21, %cst_17 [1] : vector<256x128xf32> to vector<256xf32>
    %23 = vector.shape_cast %22 : vector<256xf32> to vector<256x1xf32>
    %24 = vector.broadcast %23 : vector<256x1xf32> to vector<256x128xf32>
    %25 = arith.subf %21, %24 : vector<256x128xf32>
    %26 = math.exp %25 : vector<256x128xf32>
    %cst_18 = arith.constant dense<0.000000e+00> : vector<256xf32>
    %27 = vector.multi_reduction <add>, %26, %cst_18 [1] : vector<256x128xf32> to vector<256xf32>
    %28 = vector.shape_cast %27 : vector<256xf32> to vector<256x1xf32>
    %29 = tpu.reciprocal %28 {approx = true} : vector<256x1xf32> -> vector<256x1xf32>
    %30 = vector.broadcast %29 : vector<256x1xf32> to vector<256x128xf32>
    %31 = arith.mulf %26, %30 : vector<256x128xf32>
    %32 = vector.extract_strided_slice %31 {offsets = [0, 0], sizes = [256, 4], strides = [1, 1]} : vector<256x128xf32> to vector<256x4xf32>
    %c0_19 = arith.constant 0 : index
    %c0_20 = arith.constant 0 : index
    %33 = vector.load %arg8[%c0_19, %c0_20] : memref<256x4xf32, #tpu.memory_space<vmem>>, vector<256x4xf32>
    tpu.vector_store %arg8[%c0_19, %c0_20], %32 {strides = array<i32>} : memref<256x4xf32, #tpu.memory_space<vmem>>, vector<256x4xf32>,
    return
  }
  func.func @transform_0(%arg0: i32) -> (i32, i32) {
    %c0_i32 = arith.constant 0 : i32
    %c0_i32_0 = arith.constant 0 : i32
    return %arg0, %c0_i32 : i32, i32
  }
  func.func @transform_1(%arg0: i32) -> (i32, i32) {
    %c0_i32 = arith.constant 0 : i32
    %c0_i32_0 = arith.constant 0 : i32
    %c0_i32_1 = arith.constant 0 : i32
    return %c0_i32, %c0_i32_0 : i32, i32
  }
  func.func @transform_2(%arg0: i32) -> (i32, i32) {
    %c0_i32 = arith.constant 0 : i32
    %c0_i32_0 = arith.constant 0 : i32
    %c0_i32_1 = arith.constant 0 : i32
    return %c0_i32, %c0_i32_0 : i32, i32
  }
  func.func @transform_3(%arg0: i32) -> (i32, i32) {
    %c0_i32 = arith.constant 0 : i32
    %c0_i32_0 = arith.constant 0 : i32
    %c0_i32_1 = arith.constant 0 : i32
    return %c0_i32, %c0_i32_0 : i32, i32
  }
  func.func @transform_4(%arg0: i32) -> (i32, i32) {
    %c0_i32 = arith.constant 0 : i32
    %c0_i32_0 = arith.constant 0 : i32
    %c0_i32_1 = arith.constant 0 : i32
    return %c0_i32, %c0_i32_0 : i32, i32
  }
  func.func @transform_5(%arg0: i32) -> (i32, i32) {
    %c0_i32 = arith.constant 0 : i32
    %c0_i32_0 = arith.constant 0 : i32
    %c0_i32_1 = arith.constant 0 : i32
    return %c0_i32, %c0_i32_0 : i32, i32
  }
  func.func @transform_6(%arg0: i32) -> (i32, i32) {
    %c0_i32 = arith.constant 0 : i32
    %c0_i32_0 = arith.constant 0 : i32
    %c0_i32_1 = arith.constant 0 : i32
    return %c0_i32, %c0_i32_0 : i32, i32
  }
  func.func @transform_7(%arg0: i32) -> (i32, i32) {
    %c0_i32 = arith.constant 0 : i32
    %c0_i32_0 = arith.constant 0 : i32
    return %arg0, %c0_i32 : i32, i32
  }
}

</mosaic_0001>

<bundles_post_ra>
// kernel: _lambda_.1
= control target key start
LH: loop header
LB: loop body
LE: loop exit
PB: predicated region body
PF: predicated region fallthrough
CT: control target
= control target key end

     0   :  { %s2049_s24 = smov 0   ;;  %s2597_s0 = inlined_call_operand.vmem [shape: bf16[512,32], index: 0, kind: input, shape index: {}]   ;;  %s2598_s1 = inlined_call_operand.vmem [shape: bf16[32,128], index: 1, kind: input, shape index: {}]   ;;  %s2599_s2 = inlined_call_operand.vmem [shape: f32[1,128], index: 2, kind: input, shape index: {}]   ;;  %s2600_s3 = inlined_call_operand.vmem [shape: bf16[128,128], index: 3, kind: input, shape index: {}]   ;;  %s2601_s4 = inlined_call_operand.vmem [shape: f32[1,128], index: 4, kind: input, shape index: {}]   ;;  %s2602_s5 = inlined_call_operand.vmem [shape: bf16[128,128], index: 5, kind: input, shape index: {}]   ;;  %s2603_s6 = inlined_call_operand.vmem [shape: f32[1,128], index: 6, kind: input, shape index: {}]   ;;  %s2604_s7 = inlined_call_operand.vmem [shape: f32[512,4], index: 7, kind: output, shape index: {}]  }
   0x1 LB: > { %s1565_s25 = sadd.s32 4294967295, %s2007_s24   ;;  %p1569_p0 = scmp.ge.s32.totalorder %s2007_s24, 1  ;;  %s2007_s24 = sphi %s2049_s24, %s17_s24  }
   0x2   : > { %p238_p1 = scmp.lt.s32.totalorder %s2007_s24, 3 }
   0x4   : > { %p239_p2 = pnand %p1569_p0, %p238_p1 }
   0x5   : > { %v1839_v0 = vld [vmem:[%s2598_s1] sm:$0xff] (!%p239_p2)   ;;  %s1570_s28 = sshll.u32 (!%p239_p2), %s1565_s25, 5  ;;  %v1840_v1 = vld [vmem:[%s2598_s1 + $0x8] sm:$0xff] (!%p239_p2)   ;;  %vm418_vm0 = vcmask (!%p239_p2), 261120   ;;  %v1859_v12 = vld [vmem:[%s2600_s3 + $0x10] sm:$0xff] (!%p239_p2)   ;;  %vm1476_vm1 = vcmask (!%p239_p2), 31744  }
   0x6   : > { %242 = sbr.rel (%p239_p2) target bundleno = 1053 (0x41d), region = 48  ;;  %p271_p3 = scmp.lt.s32.totalorder (!%p239_p2), %s1570_s28, 63  ;;  %1695 = vmatprep.subr.bf16.mxu0 (!%p239_p2), %v1839_v0  ;;  %1827 = vmatprep.subr.bf16.mxu1 (!%p239_p2), %v1839_v0  ;;  %v1857_v2 = vld [vmem:[%s2600_s3] sm:$0xff] (!%p239_p2)   ;;  %v1858_v9 = vld [vmem:[%s2600_s3 + $0x8] sm:$0xff] (!%p239_p2)   ;;  %v1860_v17 = vld [vmem:[%s2600_s3 + $0x18] sm:$0xff] (!%p239_p2)  }
   0x7   : > { %1696 = vmatpush3.bf16.msra.mxu0 (!%p239_p2), %v1839_v0  ;;  %1829 = vmatpush3.bf16.msra.mxu1 (!%p239_p2), %v1839_v0  ;;  %v1861_v18 = vld [vmem:[%s2600_s3 + $0x20] sm:$0xff] (!%p239_p2)   ;;  %v1862_v22 = vld [vmem:[%s2600_s3 + $0x28] sm:$0xff] (!%p239_p2)   ;;  %v1863_v24 = vld [vmem:[%s2600_s3 + $0x30] sm:$0xff] (!%p239_p2)  }
   0x8   : > { %1697 = vmatprep.subr.bf16.mxu0 (!%p239_p2), %v1840_v1  ;;  %1828 = vmatprep.subr.bf16.mxu1 (!%p239_p2), %v1840_v1  ;;  %v1864_v25 = vld [vmem:[%s2600_s3 + $0x38] sm:$0xff] (!%p239_p2)   ;;  %v1865_v26 = vld [vmem:[%s2602_s5] sm:$0xff] (!%p239_p2)   ;;  %v1866_v27 = vld [vmem:[%s2602_s5 + $0x8] sm:$0xff] (!%p239_p2)  }
   0x9   : > { %v1867_v28 = vld [vmem:[%s2602_s5 + $0x10] sm:$0xff] (!%p239_p2)   ;;  %v1868_v29 = vld [vmem:[%s2602_s5 + $0x18] sm:$0xff] (!%p239_p2)   ;;  %v1869_v30 = vld [vmem:[%s2602_s5 + $0x20] sm:$0xff] (!%p239_p2)  }
   0xa   : > { %v1870_v31 = vld [vmem:[%s2602_s5 + $0x28] sm:$0xff] (!%p239_p2)   ;;  %v2148_v32 = vld [vmem:[%s2599_s2] ss:$0 sm:$0xff] (!%p239_p2) }
   0xb   : > { %1698 = vmatpush3.bf16.msra.mxu0 (!%p239_p2), %v1840_v1  ;;  %1830 = vmatpush3.bf16.msra.mxu1 (!%p239_p2), %v1840_v1 }
   0xc   : > { %1731 = vmatprep.subr.bf16.mxu1 (!%p239_p2), %v1857_v2  ;;  %1779 = vmatprep.subr.bf16.mxu0 (!%p239_p2), %v1865_v26 }
   0xd   : > { %s2606_s28 = smov (!%p271_p3, %s1570_s28), 63 }
   0xe   : > { %s1571_s10 = sshll.u32 %s2606_s28, 2  ;;  %s1573_s8 = sshll.u32 %s2606_s28, 3 }
   0xf   : > { %s2072_s13 = scalar_lea.vmem %s2597_s0, %s1571_s10  ;;  %s2496_s11 = scalar_lea.vmem %s2604_s7, %s1573_s8 }
  0x10   : > { %v1841_v3 = vld [vmem:[%s2072_s13] sm:$0xff]   ;;  %v1842_v4 = vld [vmem:[%s2072_s13 + $0x8] sm:$0xff]   ;;  %v1843_v5 = vld [vmem:[%s2072_s13 + $0x10] sm:$0xff]  }
  0x11   : > { %1699 = vmatprep.mubr.msk.bf16.mxu0 %vm418_vm0, %v1841_v3  ;;  %v1844_v6 = vld [vmem:[%s2072_s13 + $0x18] sm:$0xff]   ;;  %v1845_v7 = vld [vmem:[%s2072_s13 + $0x20] sm:$0xff]   ;;  %v1850_v10 = vld [vmem:[%s2072_s13 + $0x48] sm:$0xff]  }
  0x12   : > { %1700 = vmatmul.mubr.msk.bf16.vlgmr.msra.gmra.mrb[0].mxu0 %vm418_vm0, %v1842_v4  ;;  %v1849_v8 = vld [vmem:[%s2072_s13 + $0x40] sm:$0xff]   ;;  %v1851_v11 = vld [vmem:[%s2072_s13 + $0x50] sm:$0xff]   ;;  %v1846_v13 = vld [vmem:[%s2072_s13 + $0x28] sm:$0xff]  }
  0x13   : > { %1703 = vmatprep.mubr.msk.bf16.mxu0 %vm418_vm0, %v1843_v5  ;;  %1715 = vmatprep.mubr.msk.bf16.mxu1 %vm418_vm0, %v1849_v8  ;;  %v1847_v14 = vld [vmem:[%s2072_s13 + $0x30] sm:$0xff]   ;;  %v1852_v15 = vld [vmem:[%s2072_s13 + $0x58] sm:$0xff]   ;;  %v1853_v16 = vld [vmem:[%s2072_s13 + $0x60] sm:$0xff]  }
  0x14   : > { %1716 = vmatmul.mubr.msk.bf16.vlgmr.msra.gmra.mrb[0].mxu1 %vm418_vm0, %v1850_v10  ;;  %v1848_v19 = vld [vmem:[%s2072_s13 + $0x38] sm:$0xff]   ;;  %v1854_v20 = vld [vmem:[%s2072_s13 + $0x68] sm:$0xff]   ;;  %v1855_v21 = vld [vmem:[%s2072_s13 + $0x70] sm:$0xff]   ;;  %1780 = vmatpush3.bf16.msra.mxu0 %v1865_v26 }
  0x15   : > { %1719 = vmatprep.mubr.msk.bf16.mxu1 %vm418_vm0, %v1851_v11  ;;  %1732 = vmatpush3.bf16.msra.mxu1 %v1857_v2  ;;  %v1856_v23 = vld [vmem:[%s2072_s13 + $0x78] sm:$0xff]  }
  0x16   : > { %1733 = vmatprep.subr.bf16.mxu1 %v1858_v9  ;;  %1781 = vmatprep.subr.bf16.mxu0 %v1866_v27 }
  0x18   : > { %1782 = vmatpush3.bf16.msra.mxu0 %v1866_v27 }
  0x19   : > { %1734 = vmatpush3.bf16.msra.mxu1 %v1858_v9  ;;  %1783 = vmatprep.subr.bf16.mxu0 %v1867_v28 }
  0x1a   : > { %1704 = vmatmul.mubr.msk.bf16.gmra.mrb[4].mxu0 %vm418_vm0, %v1844_v6  ;;  %1735 = vmatprep.subr.bf16.mxu1 %v1859_v12 }
  0x1b   : > { %1707 = vmatprep.mubr.msk.bf16.mxu0 %vm418_vm0, %v1845_v7 }
  0x1c   : > { %1720 = vmatmul.mubr.msk.bf16.gmra.mrb[4].mxu1 %vm418_vm0, %v1852_v15  ;;  %1784 = vmatpush3.bf16.msra.mxu0 %v1867_v28 }
  0x1d   : > { %1723 = vmatprep.mubr.msk.bf16.mxu1 %vm418_vm0, %v1853_v16  ;;  %1736 = vmatpush3.bf16.msra.mxu1 %v1859_v12 }
  0x1e   : > { %1737 = vmatprep.subr.bf16.mxu1 %v1860_v17  ;;  %1785 = vmatprep.subr.bf16.mxu0 %v1868_v29 }
  0x20   : > { %1786 = vmatpush3.bf16.msra.mxu0 %v1868_v29 }
  0x21   : > { %1738 = vmatpush3.bf16.msra.mxu1 %v1860_v17  ;;  %1787 = vmatprep.subr.bf16.mxu0 %v1869_v30 }
  0x22   : > { %1708 = vmatmul.mubr.msk.bf16.gmra.mrb[8].mxu0 %vm418_vm0, %v1846_v13  ;;  %1739 = vmatprep.subr.bf16.mxu1 %v1861_v18 }
  0x23   : > { %1711 = vmatprep.mubr.msk.bf16.mxu0 %vm418_vm0, %v1847_v14 }
  0x24   : > { %1724 = vmatmul.mubr.msk.bf16.gmra.mrb[8].mxu1 %vm418_vm0, %v1854_v20  ;;  %1788 = vmatpush3.bf16.msra.mxu0 %v1869_v30 }
  0x25   : > { %1727 = vmatprep.mubr.msk.bf16.mxu1 %vm418_vm0, %v1855_v21  ;;  %1740 = vmatpush3.bf16.msra.mxu1 %v1861_v18 }
  0x26   : > { %1741 = vmatprep.subr.bf16.mxu1 %v1862_v22  ;;  %1789 = vmatprep.subr.bf16.mxu0 %v1870_v31 }
  0x28   : > { %1790 = vmatpush3.bf16.msra.mxu0 %v1870_v31 }
  0x29   : > { %1742 = vmatpush3.bf16.msra.mxu1 %v1862_v22 }
  0x2a   : > { %1712 = vmatmul.mubr.msk.bf16.gmra.mrb[12].mxu0 %vm418_vm0, %v1848_v19  ;;  %1743 = vmatprep.subr.bf16.mxu1 %v1863_v24 }
  0x2c   : > { %1728 = vmatmul.mubr.msk.bf16.gmra.mrb[12].mxu1 %vm418_vm0, %v1856_v23 }
  0x2d   : > { %1744 = vmatpush3.bf16.msra.mxu1 %v1863_v24 }
  0x2e   : > { %1745 = vmatprep.subr.bf16.mxu1 %v1864_v25 }
  0x31   : > { %1746 = vmatpush3.bf16.msra.mxu1 %v1864_v25 }
  0xe5   : > { %v1701_v33 = vpop.f32.mrb[0].mxu0 }
  0xe6   : > { %v510_v34 = vadd.f32 %v1701_v33, %v2148_v32  ;;  %v501_v35 = vpop.f32.mrb[1].mxu0 }
  0xe7   : > { %v502_v36 = vadd.f32 %v2148_v32, %v501_v35  ;;  %v1702_v37 = vpop.f32.mrb[2].mxu0  ;;  %v1717_v48 = vpop.f32.mrb[0].mxu1 }
  0xe8   : > { %v513_v38 = vadd.f32 %v1702_v37, %v2148_v32  ;;  %v504_v39 = vpop.f32.mrb[3].mxu0  ;;  %v630_v41 = vmax.f32 %v510_v34, 0.0  ;;  %v574_v51 = vadd.f32 %v1717_v48, %v2148_v32  ;;  %v565_v52 = vpop.f32.mrb[1].mxu1 }
  0xe9   : > { %v505_v40 = vadd.f32 %v2148_v32, %v504_v39  ;;  %v628_v43 = vmax.f32 %v502_v36, 0.0  ;;  %v566_v55 = vadd.f32 %v2148_v32, %v565_v52  ;;  %v1718_v56 = vpop.f32.mrb[2].mxu1 }
  0xea   : > { %v631_v42 = vmax.f32 %v513_v38, 0.0  ;;  %v646_v60 = vmax.f32 %v574_v51, 0.0  ;;  %v577_v61 = vadd.f32 %v1718_v56, %v2148_v32  ;;  %v568_v62 = vpop.f32.mrb[3].mxu1 }
  0xeb   : > { %v629_v44 = vmax.f32 %v505_v40, 0.0  ;;  %v644_v0 = vmax.f32 %v566_v55, 0.0  ;;  %v569_v1 = vadd.f32 %v2148_v32, %v568_v62 }
  0xec   : > { %v661_v45 = vpack.c.bf16 %v631_v42, %v630_v41  ;;  %v647_v3 = vmax.f32 %v577_v61, 0.0 }
  0xed   : > { %v660_v46 = vpack.c.bf16 %v629_v44, %v628_v43  ;;  %v1705_v47 = vpop.f32.mrb[4].mxu0  ;;  %v645_v6 = vmax.f32 %v569_v1, 0.0 }
  0xee   : > { %v526_v49 = vadd.f32 %v1705_v47, %v2148_v32  ;;  %v517_v50 = vpop.f32.mrb[5].mxu0  ;;  %v2162_v8 = vpack.c.bf16 %v647_v3, %v646_v60 }
  0xef   : > { %v518_v53 = vadd.f32 %v2148_v32, %v517_v50  ;;  %v1706_v54 = vpop.f32.mrb[6].mxu0  ;;  %1747 = vmatprep.mubr.bf16.mxu1 %v660_v46  ;;  %v2164_v11 = vpack.c.bf16 %v645_v6, %v644_v0  ;;  %v1721_v12 = vpop.f32.mrb[4].mxu1 }
  0xf0   : > { %v634_v57 = vmax.f32 %v526_v49, 0.0  ;;  %v529_v58 = vadd.f32 %v1706_v54, %v2148_v32  ;;  %v520_v59 = vpop.f32.mrb[7].mxu0  ;;  %1748 = vmatmul.mubr.bf16.vlgmr.msra.gmra.mrb[16].mxu1 %v661_v45  ;;  %v590_v15 = vadd.f32 %v1721_v12, %v2148_v32  ;;  %v581_v16 = vpop.f32.mrb[5].mxu1 }
  0xf1   : > { %v521_v63 = vadd.f32 %v2148_v32, %v520_v59  ;;  %v632_v4 = vmax.f32 %v518_v53, 0.0  ;;  %v582_v19 = vadd.f32 %v2148_v32, %v581_v16  ;;  %v1722_v20 = vpop.f32.mrb[6].mxu1 }
  0xf2   : > { %v635_v2 = vmax.f32 %v529_v58, 0.0  ;;  %v650_v24 = vmax.f32 %v590_v15, 0.0  ;;  %v593_v25 = vadd.f32 %v1722_v20, %v2148_v32  ;;  %v584_v26 = vpop.f32.mrb[7].mxu1  ;;  %v1871_v20 = vld [vmem:[%s2602_s5 + $0x30] sm:$0xff]  }
  0xf3   : > { %v633_v5 = vmax.f32 %v521_v63, 0.0  ;;  %v648_v28 = vmax.f32 %v582_v19, 0.0  ;;  %v585_v29 = vadd.f32 %v2148_v32, %v584_v26  ;;  %1791 = vmatprep.subr.bf16.mxu0 %v1871_v20 }
  0xf4   : > { %v663_v7 = vpack.c.bf16 %v635_v2, %v634_v57  ;;  %v651_v31 = vmax.f32 %v593_v25, 0.0  ;;  %1792 = vmatpush3.bf16.msra.mxu0 %v1871_v20 }
  0xf5   : > { %v662_v9 = vpack.c.bf16 %v633_v5, %v632_v4  ;;  %v1709_v10 = vpop.f32.mrb[8].mxu0  ;;  %v649_v35 = vmax.f32 %v585_v29, 0.0 }
  0xf6   : > { %v542_v13 = vadd.f32 %v1709_v10, %v2148_v32  ;;  %v533_v14 = vpop.f32.mrb[9].mxu0  ;;  %v671_v37 = vpack.c.bf16 %v651_v31, %v650_v24 }
  0xf7   : > { %v534_v17 = vadd.f32 %v2148_v32, %v533_v14  ;;  %v1710_v18 = vpop.f32.mrb[10].mxu0  ;;  %1751 = vmatprep.mubr.bf16.mxu1 %v662_v9  ;;  %v670_v40 = vpack.c.bf16 %v649_v35, %v648_v28  ;;  %v1725_v41 = vpop.f32.mrb[8].mxu1 }
  0xf8   : > { %v638_v21 = vmax.f32 %v542_v13, 0.0  ;;  %v545_v22 = vadd.f32 %v1710_v18, %v2148_v32  ;;  %v536_v23 = vpop.f32.mrb[11].mxu0  ;;  %1752 = vmatmul.mubr.bf16.gmra.mrb[20].mxu1 %v663_v7  ;;  %v606_v44 = vadd.f32 %v1725_v41, %v2148_v32  ;;  %v597_v45 = vpop.f32.mrb[9].mxu1 }
  0xf9   : > { %v537_v27 = vadd.f32 %v2148_v32, %v536_v23  ;;  %v636_v33 = vmax.f32 %v534_v17, 0.0  ;;  %v598_v48 = vadd.f32 %v2148_v32, %v597_v45  ;;  %v1726_v49 = vpop.f32.mrb[10].mxu1 }
  0xfa   : > { %v639_v30 = vmax.f32 %v545_v22, 0.0  ;;  %v654_v53 = vmax.f32 %v606_v44, 0.0  ;;  %v609_v54 = vadd.f32 %v1726_v49, %v2148_v32  ;;  %v600_v55 = vpop.f32.mrb[11].mxu1 }
  0xfb   : > { %v637_v34 = vmax.f32 %v537_v27, 0.0  ;;  %v652_v57 = vmax.f32 %v598_v48, 0.0  ;;  %v601_v58 = vadd.f32 %v2148_v32, %v600_v55 }
  0xfc   : > { %v665_v36 = vpack.c.bf16 %v639_v30, %v638_v21  ;;  %v655_v60 = vmax.f32 %v609_v54, 0.0 }
  0xfd   : > { %v664_v38 = vpack.c.bf16 %v637_v34, %v636_v33  ;;  %v1713_v39 = vpop.f32.mrb[12].mxu0  ;;  %v653_v63 = vmax.f32 %v601_v58, 0.0 }
  0xfe   : > { %v558_v42 = vadd.f32 %v1713_v39, %v2148_v32  ;;  %v549_v43 = vpop.f32.mrb[13].mxu0  ;;  %v673_v1 = vpack.c.bf16 %v655_v60, %v654_v53 }
  0xff   : > { %v550_v46 = vadd.f32 %v2148_v32, %v549_v43  ;;  %v1714_v47 = vpop.f32.mrb[14].mxu0  ;;  %1755 = vmatprep.mubr.bf16.mxu1 %v664_v38  ;;  %v672_v3 = vpack.c.bf16 %v653_v63, %v652_v57  ;;  %v1729_v4 = vpop.f32.mrb[12].mxu1 }
 0x100   : > { %v642_v50 = vmax.f32 %v558_v42, 0.0  ;;  %v561_v51 = vadd.f32 %v1714_v47, %v2148_v32  ;;  %v552_v52 = vpop.f32.mrb[15].mxu0  ;;  %1756 = vmatmul.mubr.bf16.gmra.mrb[24].mxu1 %v665_v36  ;;  %v622_v5 = vadd.f32 %v1729_v4, %v2148_v32  ;;  %v613_v6 = vpop.f32.mrb[13].mxu1 }
 0x101   : > { %v553_v56 = vadd.f32 %v2148_v32, %v552_v52  ;;  %v640_v61 = vmax.f32 %v550_v46, 0.0  ;;  %v614_v7 = vadd.f32 %v2148_v32, %v613_v6  ;;  %v1730_v9 = vpop.f32.mrb[14].mxu1 }
 0x102   : > { %v643_v59 = vmax.f32 %v561_v51, 0.0  ;;  %v658_v10 = vmax.f32 %v622_v5, 0.0  ;;  %v625_v12 = vadd.f32 %v1730_v9, %v2148_v32  ;;  %v616_v13 = vpop.f32.mrb[15].mxu1 }
 0x103   : > { %v641_v62 = vmax.f32 %v553_v56, 0.0  ;;  %v656_v14 = vmax.f32 %v614_v7, 0.0  ;;  %v617_v15 = vadd.f32 %v2148_v32, %v616_v13  ;;  %v1872_v32 = vld [vmem:[%s2602_s5 + $0x38] sm:$0xff]  }
 0x104   : > { %v667_v0 = vpack.c.bf16 %v643_v59, %v642_v50  ;;  %v659_v16 = vmax.f32 %v625_v12, 0.0  ;;  %1793 = vmatprep.subr.bf16.mxu0 %v1872_v32 }
 0x105   : > { %v666_v2 = vpack.c.bf16 %v641_v62, %v640_v61  ;;  %v657_v17 = vmax.f32 %v617_v15, 0.0  ;;  %1794 = vmatpush3.bf16.msra.mxu0 %v1872_v32 }
 0x106   : > { %v675_v18 = vpack.c.bf16 %v659_v16, %v658_v10 }
 0x107   : > { %1759 = vmatprep.mubr.bf16.mxu1 %v666_v2  ;;  %v674_v19 = vpack.c.bf16 %v657_v17, %v656_v14 }
 0x108   : > { %1760 = vmatmul.mubr.bf16.gmra.mrb[28].mxu1 %v667_v0 }
 0x109   : > { %1763 = vmatprep.mubr.bf16.mxu1 %v2164_v11 }
 0x110   : > { %1764 = vmatmul.mubr.bf16.gmra.mrb[32].mxu1 %v2162_v8  ;;  %v2197_v8 = vld [vmem:[%s2601_s4] ss:$0 sm:$0xff] }
 0x111   : > { %1767 = vmatprep.mubr.bf16.mxu1 %v670_v40 }
 0x118   : > { %1768 = vmatmul.mubr.bf16.gmra.mrb[36].mxu1 %v671_v37 }
 0x119   : > { %1771 = vmatprep.mubr.bf16.mxu1 %v672_v3 }
 0x120   : > { %1772 = vmatmul.mubr.bf16.gmra.mrb[40].mxu1 %v673_v1 }
 0x121   : > { %1775 = vmatprep.mubr.bf16.mxu1 %v674_v19 }
 0x128   : > { %1776 = vmatmul.mubr.bf16.gmra.mrb[44].mxu1 %v675_v18 }
 0x1c3   : > { %v1749_v11 = vpop.f32.mrb[16].mxu1 }
 0x1c4   : > { %v790_v21 = vadd.f32 %v1749_v11, %v2197_v8  ;;  %v781_v22 = vpop.f32.mrb[17].mxu1 }
 0x1c5   : > { %v782_v23 = vadd.f32 %v2197_v8, %v781_v22  ;;  %v1750_v24 = vpop.f32.mrb[18].mxu1 }
 0x1c6   : > { %v793_v25 = vadd.f32 %v1750_v24, %v2197_v8  ;;  %v784_v26 = vpop.f32.mrb[19].mxu1  ;;  %v910_v28 = vmax.f32 %v790_v21, 0.0 }
 0x1c7   : > { %v785_v27 = vadd.f32 %v2197_v8, %v784_v26  ;;  %v908_v30 = vmax.f32 %v782_v23, 0.0 }
 0x1c8   : > { %v911_v29 = vmax.f32 %v793_v25, 0.0 }
 0x1c9   : > { %v909_v31 = vmax.f32 %v785_v27, 0.0 }
 0x1ca   : > { %v941_v33 = vpack.c.bf16 %v911_v29, %v910_v28 }
 0x1cb   : > { %v940_v34 = vpack.c.bf16 %v909_v31, %v908_v30  ;;  %v1753_v35 = vpop.f32.mrb[20].mxu1 }
 0x1cc   : > { %v806_v36 = vadd.f32 %v1753_v35, %v2197_v8  ;;  %v797_v37 = vpop.f32.mrb[21].mxu1 }
 0x1cd   : > { %v798_v38 = vadd.f32 %v2197_v8, %v797_v37  ;;  %v1754_v39 = vpop.f32.mrb[22].mxu1  ;;  %1795 = vmatprep.mubr.bf16.mxu0 %v940_v34 }
 0x1ce   : > { %v809_v40 = vadd.f32 %v1754_v39, %v2197_v8  ;;  %v800_v41 = vpop.f32.mrb[23].mxu1  ;;  %1796 = vmatmul.mubr.bf16.vlgmr.msra.gmra.mrb[16].mxu0 %v941_v33  ;;  %v914_v43 = vmax.f32 %v806_v36, 0.0 }
 0x1cf   : > { %v801_v42 = vadd.f32 %v2197_v8, %v800_v41  ;;  %v912_v45 = vmax.f32 %v798_v38, 0.0 }
 0x1d0   : > { %v915_v44 = vmax.f32 %v809_v40, 0.0 }
 0x1d1   : > { %v913_v46 = vmax.f32 %v801_v42, 0.0 }
 0x1d2   : > { %v943_v47 = vpack.c.bf16 %v915_v44, %v914_v43 }
 0x1d3   : > { %v942_v48 = vpack.c.bf16 %v913_v46, %v912_v45  ;;  %v1757_v49 = vpop.f32.mrb[24].mxu1 }
 0x1d4   : > { %v822_v50 = vadd.f32 %v1757_v49, %v2197_v8  ;;  %v813_v51 = vpop.f32.mrb[25].mxu1 }
 0x1d5   : > { %v814_v52 = vadd.f32 %v2197_v8, %v813_v51  ;;  %v1758_v53 = vpop.f32.mrb[26].mxu1  ;;  %1799 = vmatprep.mubr.bf16.mxu0 %v942_v48 }
 0x1d6   : > { %v825_v54 = vadd.f32 %v1758_v53, %v2197_v8  ;;  %v816_v55 = vpop.f32.mrb[27].mxu1  ;;  %1800 = vmatmul.mubr.bf16.gmra.mrb[20].mxu0 %v943_v47  ;;  %v918_v57 = vmax.f32 %v822_v50, 0.0 }
 0x1d7   : > { %v817_v56 = vadd.f32 %v2197_v8, %v816_v55  ;;  %v916_v59 = vmax.f32 %v814_v52, 0.0 }
 0x1d8   : > { %v919_v58 = vmax.f32 %v825_v54, 0.0 }
 0x1d9   : > { %v917_v60 = vmax.f32 %v817_v56, 0.0 }
 0x1da   : > { %v945_v61 = vpack.c.bf16 %v919_v58, %v918_v57 }
 0x1db   : > { %v944_v62 = vpack.c.bf16 %v917_v60, %v916_v59  ;;  %v1761_v63 = vpop.f32.mrb[28].mxu1 }
 0x1dc   : > { %v838_v0 = vadd.f32 %v1761_v63, %v2197_v8  ;;  %v829_v1 = vpop.f32.mrb[29].mxu1 }
 0x1dd   : > { %v830_v2 = vadd.f32 %v2197_v8, %v829_v1  ;;  %v1762_v3 = vpop.f32.mrb[30].mxu1  ;;  %1803 = vmatprep.mubr.bf16.mxu0 %v944_v62 }
 0x1de   : > { %v841_v4 = vadd.f32 %v1762_v3, %v2197_v8  ;;  %v832_v5 = vpop.f32.mrb[31].mxu1  ;;  %1804 = vmatmul.mubr.bf16.gmra.mrb[24].mxu0 %v945_v61  ;;  %v922_v7 = vmax.f32 %v838_v0, 0.0 }
 0x1df   : > { %v833_v6 = vadd.f32 %v2197_v8, %v832_v5  ;;  %v920_v10 = vmax.f32 %v830_v2, 0.0 }
 0x1e0   : > { %v923_v9 = vmax.f32 %v841_v4, 0.0 }
 0x1e1   : > { %v921_v12 = vmax.f32 %v833_v6, 0.0  ;;  %v2234_v6 = vld [vmem:[%s2603_s6] ss:$0 sm:$0xff] }
 0x1e2   : > { %v947_v13 = vpack.c.bf16 %v923_v9, %v922_v7 }
 0x1e3   : > { %v946_v14 = vpack.c.bf16 %v921_v12, %v920_v10  ;;  %v1765_v15 = vpop.f32.mrb[32].mxu1 }
 0x1e4   : > { %v854_v16 = vadd.f32 %v1765_v15, %v2197_v8  ;;  %v845_v17 = vpop.f32.mrb[33].mxu1 }
 0x1e5   : > { %v846_v18 = vadd.f32 %v2197_v8, %v845_v17  ;;  %v1766_v19 = vpop.f32.mrb[34].mxu1  ;;  %1807 = vmatprep.mubr.bf16.mxu0 %v946_v14 }
 0x1e6   : > { %v857_v20 = vadd.f32 %v1766_v19, %v2197_v8  ;;  %v848_v32 = vpop.f32.mrb[35].mxu1  ;;  %1808 = vmatmul.mubr.bf16.gmra.mrb[28].mxu0 %v947_v13  ;;  %v926_v21 = vmax.f32 %v854_v16, 0.0 }
 0x1e7   : > { %v849_v11 = vadd.f32 %v2197_v8, %v848_v32  ;;  %v924_v23 = vmax.f32 %v846_v18, 0.0 }
 0x1e8   : > { %v927_v22 = vmax.f32 %v857_v20, 0.0 }
 0x1e9   : > { %v925_v24 = vmax.f32 %v849_v11, 0.0 }
 0x1ea   : > { %v949_v25 = vpack.c.bf16 %v927_v22, %v926_v21 }
 0x1eb   : > { %v948_v26 = vpack.c.bf16 %v925_v24, %v924_v23  ;;  %v1769_v27 = vpop.f32.mrb[36].mxu1 }
 0x1ec   : > { %v870_v28 = vadd.f32 %v1769_v27, %v2197_v8  ;;  %v861_v29 = vpop.f32.mrb[37].mxu1 }
 0x1ed   : > { %v862_v30 = vadd.f32 %v2197_v8, %v861_v29  ;;  %v1770_v31 = vpop.f32.mrb[38].mxu1  ;;  %1811 = vmatprep.mubr.bf16.mxu0 %v948_v26 }
 0x1ee   : > { %v873_v33 = vadd.f32 %v1770_v31, %v2197_v8  ;;  %v864_v34 = vpop.f32.mrb[39].mxu1  ;;  %1812 = vmatmul.mubr.bf16.gmra.mrb[32].mxu0 %v949_v25  ;;  %v930_v36 = vmax.f32 %v870_v28, 0.0 }
 0x1ef   : > { %v865_v35 = vadd.f32 %v2197_v8, %v864_v34  ;;  %v928_v38 = vmax.f32 %v862_v30, 0.0 }
 0x1f0   : > { %v931_v37 = vmax.f32 %v873_v33, 0.0 }
 0x1f1   : > { %v929_v39 = vmax.f32 %v865_v35, 0.0 }
 0x1f2   : > { %v951_v40 = vpack.c.bf16 %v931_v37, %v930_v36 }
 0x1f3   : > { %v950_v41 = vpack.c.bf16 %v929_v39, %v928_v38  ;;  %v1773_v42 = vpop.f32.mrb[40].mxu1 }
 0x1f4   : > { %v886_v43 = vadd.f32 %v1773_v42, %v2197_v8  ;;  %v877_v44 = vpop.f32.mrb[41].mxu1 }
 0x1f5   : > { %v878_v45 = vadd.f32 %v2197_v8, %v877_v44  ;;  %v1774_v46 = vpop.f32.mrb[42].mxu1  ;;  %1815 = vmatprep.mubr.bf16.mxu0 %v950_v41 }
 0x1f6   : > { %v889_v47 = vadd.f32 %v1774_v46, %v2197_v8  ;;  %v880_v48 = vpop.f32.mrb[43].mxu1  ;;  %1816 = vmatmul.mubr.bf16.gmra.mrb[36].mxu0 %v951_v40  ;;  %v934_v50 = vmax.f32 %v886_v43, 0.0 }
 0x1f7   : > { %v881_v49 = vadd.f32 %v2197_v8, %v880_v48  ;;  %v932_v52 = vmax.f32 %v878_v45, 0.0 }
 0x1f8   : > { %v935_v51 = vmax.f32 %v889_v47, 0.0 }
 0x1f9   : > { %v933_v53 = vmax.f32 %v881_v49, 0.0 }
 0x1fa   : > { %v953_v54 = vpack.c.bf16 %v935_v51, %v934_v50 }
 0x1fb   : > { %v952_v55 = vpack.c.bf16 %v933_v53, %v932_v52  ;;  %v1777_v56 = vpop.f32.mrb[44].mxu1 }
 0x1fc   : > { %v902_v57 = vadd.f32 %v1777_v56, %v2197_v8  ;;  %v893_v58 = vpop.f32.mrb[45].mxu1 }
 0x1fd   : > { %v894_v59 = vadd.f32 %v2197_v8, %v893_v58  ;;  %v1778_v60 = vpop.f32.mrb[46].mxu1  ;;  %1819 = vmatprep.mubr.bf16.mxu0 %v952_v55 }
 0x1fe   : > { %v905_v61 = vadd.f32 %v1778_v60, %v2197_v8  ;;  %v896_v62 = vpop.f32.mrb[47].mxu1  ;;  %1820 = vmatmul.mubr.bf16.gmra.mrb[40].mxu0 %v953_v54  ;;  %v938_v0 = vmax.f32 %v902_v57, 0.0 }
 0x1ff   : > { %v897_v63 = vadd.f32 %v2197_v8, %v896_v62  ;;  %v936_v2 = vmax.f32 %v894_v59, 0.0 }
 0x200   : > { %v939_v1 = vmax.f32 %v905_v61, 0.0 }
 0x201   : > { %v937_v3 = vmax.f32 %v897_v63, 0.0 }
 0x202   : > { %v955_v4 = vpack.c.bf16 %v939_v1, %v938_v0 }
 0x203   : > { %v954_v5 = vpack.c.bf16 %v937_v3, %v936_v2 }
 0x205   : > { %1823 = vmatprep.mubr.bf16.mxu0 %v954_v5 }
 0x206   : > { %1824 = vmatmul.mubr.bf16.gmra.mrb[44].mxu0 %v955_v4 }
 0x2a1   : > { %v1797_v7 = vpop.f32.mrb[16].mxu0 }
 0x2a2   : > { %v2237_v9 = vadd.f32 %v1797_v7, %v2234_v6  ;;  %v1061_v10 = vpop.f32.mrb[17].mxu0 }
 0x2a3   : > { %v2240_v8 = vadd.f32 %v2234_v6, %v1061_v10  ;;  %v1798_v12 = vpop.f32.mrb[18].mxu0 }
 0x2a4   : > { %1192 = vmax.xlane.f32.xlu1 %v2237_v9  ;;  %v1064_v13 = vpop.f32.mrb[19].mxu0  ;;  %v2245_v14 = vadd.f32 %v1798_v12, %v2234_v6 }
 0x2a5   : > { %1188 = vmax.xlane.f32.xlu0 %v2240_v8  ;;  %v2248_v15 = vadd.f32 %v2234_v6, %v1064_v13 }
 0x2a8   : > { %1194 = vmax.xlane.f32.xlu1 %v2245_v14 }
 0x2a9   : > { %v1801_v16 = vpop.f32.mrb[20].mxu0  ;;  %1190 = vmax.xlane.f32.xlu0 %v2248_v15 }
 0x2aa   : > { %v2253_v17 = vadd.f32 %v1801_v16, %v2234_v6  ;;  %v1077_v18 = vpop.f32.mrb[21].mxu0 }
 0x2ab   : > { %v1802_v19 = vpop.f32.mrb[22].mxu0  ;;  %v2261_v11 = vadd.f32 %v2234_v6, %v1077_v18 }
 0x2ac   : > { %v2256_v20 = vadd.f32 %v1802_v19, %v2234_v6  ;;  %v1080_v32 = vpop.f32.mrb[23].mxu0 }
 0x2ad   : > { %1200 = vmax.xlane.f32.xlu0 %v2253_v17  ;;  %v2264_v21 = vadd.f32 %v2234_v6, %v1080_v32 }
 0x2ae   : > { %1202 = vmax.xlane.f32.xlu1 %v2256_v20 }
 0x2b1   : > { %v1805_v22 = vpop.f32.mrb[24].mxu0  ;;  %1196 = vmax.xlane.f32.xlu0 %v2261_v11 }
 0x2b2   : > { %v2268_v23 = vadd.f32 %v1805_v22, %v2234_v6  ;;  %v1093_v24 = vpop.f32.mrb[25].mxu0  ;;  %1198 = vmax.xlane.f32.xlu1 %v2264_v21 }
 0x2b3   : > { %v1806_v25 = vpop.f32.mrb[26].mxu0  ;;  %v2277_v28 = vadd.f32 %v2234_v6, %v1093_v24 }
 0x2b4   : > { %v2272_v26 = vadd.f32 %v1806_v25, %v2234_v6  ;;  %v1096_v27 = vpop.f32.mrb[27].mxu0 }
 0x2b5   : > { %1208 = vmax.xlane.f32.xlu0 %v2268_v23  ;;  %v2280_v29 = vadd.f32 %v2234_v6, %v1096_v27 }
 0x2b6   : > { %1210 = vmax.xlane.f32.xlu1 %v2272_v26 }
 0x2b9   : > { %v1809_v30 = vpop.f32.mrb[28].mxu0  ;;  %1204 = vmax.xlane.f32.xlu0 %v2277_v28 }
 0x2ba   : > { %v2284_v31 = vadd.f32 %v1809_v30, %v2234_v6  ;;  %v1109_v33 = vpop.f32.mrb[29].mxu0  ;;  %1206 = vmax.xlane.f32.xlu1 %v2280_v29 }
 0x2bb   : > { %v1810_v34 = vpop.f32.mrb[30].mxu0  ;;  %v2293_v37 = vadd.f32 %v2234_v6, %v1109_v33 }
 0x2bc   : > { %v2288_v35 = vadd.f32 %v1810_v34, %v2234_v6  ;;  %v1112_v36 = vpop.f32.mrb[31].mxu0 }
 0x2bd   : > { %1216 = vmax.xlane.f32.xlu0 %v2284_v31  ;;  %v2296_v38 = vadd.f32 %v2234_v6, %v1112_v36 }
 0x2be   : > { %1218 = vmax.xlane.f32.xlu1 %v2288_v35 }
 0x2c1   : > { %v1813_v39 = vpop.f32.mrb[32].mxu0  ;;  %1212 = vmax.xlane.f32.xlu0 %v2293_v37 }
 0x2c2   : > { %v2300_v40 = vadd.f32 %v1813_v39, %v2234_v6  ;;  %v1125_v41 = vpop.f32.mrb[33].mxu0  ;;  %1214 = vmax.xlane.f32.xlu1 %v2296_v38 }
 0x2c3   : > { %v1814_v42 = vpop.f32.mrb[34].mxu0  ;;  %v2309_v45 = vadd.f32 %v2234_v6, %v1125_v41 }
 0x2c4   : > { %v2304_v43 = vadd.f32 %v1814_v42, %v2234_v6  ;;  %v1128_v44 = vpop.f32.mrb[35].mxu0 }
 0x2c5   : > { %1224 = vmax.xlane.f32.xlu0 %v2300_v40  ;;  %v2312_v46 = vadd.f32 %v2234_v6, %v1128_v44 }
 0x2c6   : > { %1226 = vmax.xlane.f32.xlu1 %v2304_v43 }
 0x2c9   : > { %v1817_v47 = vpop.f32.mrb[36].mxu0  ;;  %1220 = vmax.xlane.f32.xlu0 %v2309_v45 }
 0x2ca   : > { %v2316_v48 = vadd.f32 %v1817_v47, %v2234_v6  ;;  %v1141_v49 = vpop.f32.mrb[37].mxu0  ;;  %1222 = vmax.xlane.f32.xlu1 %v2312_v46 }
 0x2cb   : > { %v1818_v50 = vpop.f32.mrb[38].mxu0  ;;  %v2325_v53 = vadd.f32 %v2234_v6, %v1141_v49 }
 0x2cc   : > { %v2320_v51 = vadd.f32 %v1818_v50, %v2234_v6  ;;  %v1144_v52 = vpop.f32.mrb[39].mxu0 }
 0x2cd   : > { %1232 = vmax.xlane.f32.xlu0 %v2316_v48  ;;  %v2328_v54 = vadd.f32 %v2234_v6, %v1144_v52 }
 0x2ce   : > { %1234 = vmax.xlane.f32.xlu1 %v2320_v51 }
 0x2d1   : > { %v1821_v55 = vpop.f32.mrb[40].mxu0  ;;  %1228 = vmax.xlane.f32.xlu0 %v2325_v53 }
 0x2d2   : > { %v2332_v56 = vadd.f32 %v1821_v55, %v2234_v6  ;;  %v1157_v57 = vpop.f32.mrb[41].mxu0  ;;  %1230 = vmax.xlane.f32.xlu1 %v2328_v54 }
 0x2d3   : > { %v1822_v58 = vpop.f32.mrb[42].mxu0  ;;  %v2341_v61 = vadd.f32 %v2234_v6, %v1157_v57 }
 0x2d4   : > { %v2336_v59 = vadd.f32 %v1822_v58, %v2234_v6  ;;  %v1160_v60 = vpop.f32.mrb[43].mxu0 }
 0x2d5   : > { %1240 = vmax.xlane.f32.xlu0 %v2332_v56  ;;  %v2344_v62 = vadd.f32 %v2234_v6, %v1160_v60 }
 0x2d6   : > { %1242 = vmax.xlane.f32.xlu1 %v2336_v59 }
 0x2d9   : > { %v1825_v63 = vpop.f32.mrb[44].mxu0  ;;  %1236 = vmax.xlane.f32.xlu0 %v2341_v61 }
 0x2da   : > { %v1173_v0 = vpop.f32.mrb[45].mxu0  ;;  %1238 = vmax.xlane.f32.xlu1 %v2344_v62  ;;  %v2356_v5 = vadd.f32 %v1825_v63, %v2234_v6 }
 0x2db   : > { %v2349_v1 = vadd.f32 %v2234_v6, %v1173_v0  ;;  %v1826_v2 = vpop.f32.mrb[46].mxu0 }
 0x2dc   : > { %v1176_v3 = vpop.f32.mrb[47].mxu0  ;;  %v2360_v7 = vadd.f32 %v1826_v2, %v2234_v6 }
 0x2dd   : > { %v2352_v4 = vadd.f32 %v2234_v6, %v1176_v3  ;;  %1244 = vmax.xlane.f32.xlu0 %v2349_v1 }
 0x2df   : > { %1246 = vmax.xlane.f32.xlu1 %v2352_v4 }
 0x2e1   : > { %1248 = vmax.xlane.f32.xlu0 %v2356_v5 }
 0x2e3   : > { %1250 = vmax.xlane.f32.xlu1 %v2360_v7 }
 0x331   : > { %v1193_v10 = vpop.xlane.xlu1 %1192 }
 0x332   : > { %v1254_v12 = vsub.f32 %v2237_v9, %v1193_v10  ;;  %v1189_v13 = vpop.xlane.xlu0 %1188 }
 0x333   : > { %v1252_v16 = vsub.f32 %v2240_v8, %v1189_v13 }
 0x334   : > { %v1288_v18 = vmul.f32 1.442695, %v1254_v12 }
 0x335   : > { %v1284_v19 = vmul.f32 1.442695, %v1252_v16  ;;  %v1195_v32 = vpop.xlane.xlu1 %1194 }
 0x336   : > { %1873 = vpow2.f32 %v1288_v18  ;;  %v1255_v22 = vsub.f32 %v2245_v14, %v1195_v32  ;;  %v1191_v24 = vpop.xlane.xlu0 %1190 }
 0x337   : > { %v1253_v6 = vsub.f32 %v2248_v15, %v1191_v24  ;;  %1875 = vpow2.f32 %v1284_v19 }
 0x338   : > { %v1290_v25 = vmul.f32 1.442695, %v1255_v22 }
 0x339   : > { %v1286_v27 = vmul.f32 1.442695, %v1253_v6 }
 0x33a   : > { %1877 = vpow2.f32 %v1290_v25  ;;  %v1201_v30 = vpop.xlane.xlu0 %1200 }
 0x33b   : > { %v1258_v33 = vsub.f32 %v2253_v17, %v1201_v30  ;;  %v1203_v9 = vpop.xlane.xlu1 %1202  ;;  %1879 = vpow2.f32 %v1286_v27 }
 0x33c   : > { %v1259_v34 = vsub.f32 %v2256_v20, %v1203_v9 }
 0x33d   : > { %v1296_v8 = vmul.f32 1.442695, %v1258_v33 }
 0x33e   : > { %v1298_v36 = vmul.f32 1.442695, %v1259_v34  ;;  %v1197_v39 = vpop.xlane.xlu0 %1196 }
 0x33f   : > { %1881 = vpow2.f32 %v1296_v8  ;;  %v1256_v14 = vsub.f32 %v2261_v11, %v1197_v39  ;;  %v1199_v41 = vpop.xlane.xlu1 %1198 }
 0x340   : > { %v2371_v42 = vpop.eup %1873  ;;  %v1257_v15 = vsub.f32 %v2264_v21, %v1199_v41  ;;  %1883 = vpow2.f32 %v1298_v36 }
 0x341   : > { %v1292_v44 = vmul.f32 1.442695, %v1256_v14  ;;  %1352 = vadd.xlane.f32.xlu0 %v2371_v42  ;;  %v2375_v49 = vpop.eup %1875 }
 0x342   : > { %v1294_v17 = vmul.f32 1.442695, %v1257_v15  ;;  %v1209_v47 = vpop.xlane.xlu0 %1208 }
 0x343   : > { %1885 = vpow2.f32 %v1292_v44  ;;  %v1262_v20 = vsub.f32 %v2268_v23, %v1209_v47  ;;  %v1211_v50 = vpop.xlane.xlu1 %1210 }
 0x344   : > { %v2378_v52 = vpop.eup %1877  ;;  %v1263_v11 = vsub.f32 %v2272_v26, %v1211_v50  ;;  %1887 = vpow2.f32 %v1294_v17 }
 0x345   : > { %v1304_v55 = vmul.f32 1.442695, %v1262_v20  ;;  %1354 = vadd.xlane.f32.xlu1 %v2378_v52  ;;  %1348 = vadd.xlane.f32.xlu0 %v2375_v49  ;;  %v2384_v63 = vpop.eup %1879 }
 0x346   : > { %v1306_v21 = vmul.f32 1.442695, %v1263_v11  ;;  %v1205_v57 = vpop.xlane.xlu0 %1204 }
 0x347   : > { %1889 = vpow2.f32 %v1304_v55  ;;  %v1260_v58 = vsub.f32 %v2277_v28, %v1205_v57  ;;  %v1207_v60 = vpop.xlane.xlu1 %1206 }
 0x348   : > { %v1261_v23 = vsub.f32 %v2280_v29, %v1207_v60  ;;  %1891 = vpow2.f32 %v1306_v21 }
 0x349   : > { %v2387_v0 = vpop.eup %1881  ;;  %v1300_v2 = vmul.f32 1.442695, %v1260_v58  ;;  %1350 = vadd.xlane.f32.xlu1 %v2384_v63 }
 0x34a   : > { %v1302_v26 = vmul.f32 1.442695, %v1261_v23  ;;  %1360 = vadd.xlane.f32.xlu0 %v2387_v0  ;;  %v1217_v3 = vpop.xlane.xlu0 %1216  ;;  %v2392_v28 = vpop.eup %1883 }
 0x34b   : > { %1893 = vpow2.f32 %v1300_v2  ;;  %v1266_v10 = vsub.f32 %v2284_v31, %v1217_v3  ;;  %v1219_v12 = vpop.xlane.xlu1 %1218 }
 0x34c   : > { %v1267_v13 = vsub.f32 %v2288_v35, %v1219_v12  ;;  %1895 = vpow2.f32 %v1302_v26 }
 0x34d   : > { %v2395_v16 = vpop.eup %1885  ;;  %v1312_v29 = vmul.f32 1.442695, %v1266_v10  ;;  %1362 = vadd.xlane.f32.xlu1 %v2392_v28 }
 0x34e   : > { %v1314_v18 = vmul.f32 1.442695, %v1267_v13  ;;  %1356 = vadd.xlane.f32.xlu0 %v2395_v16  ;;  %v1213_v19 = vpop.xlane.xlu0 %1212  ;;  %v2400_v31 = vpop.eup %1887 }
 0x34f   : > { %1897 = vpow2.f32 %v1312_v29  ;;  %v1264_v32 = vsub.f32 %v2293_v37, %v1213_v19  ;;  %v1215_v22 = vpop.xlane.xlu1 %1214 }
 0x350   : > { %v1265_v24 = vsub.f32 %v2296_v38, %v1215_v22  ;;  %1899 = vpow2.f32 %v1314_v18 }
 0x351   : > { %v2403_v6 = vpop.eup %1889  ;;  %v1308_v35 = vmul.f32 1.442695, %v1264_v32  ;;  %1358 = vadd.xlane.f32.xlu1 %v2400_v31 }
 0x352   : > { %v1310_v25 = vmul.f32 1.442695, %v1265_v24  ;;  %1368 = vadd.xlane.f32.xlu0 %v2403_v6  ;;  %v1225_v27 = vpop.xlane.xlu0 %1224  ;;  %v2408_v37 = vpop.eup %1891 }
 0x353   : > { %1901 = vpow2.f32 %v1308_v35  ;;  %v1270_v30 = vsub.f32 %v2300_v40, %v1225_v27  ;;  %v1227_v33 = vpop.xlane.xlu1 %1226 }
 0x354   : > { %v1271_v9 = vsub.f32 %v2304_v43, %v1227_v33  ;;  %1903 = vpow2.f32 %v1310_v25 }
 0x355   : > { %v2411_v34 = vpop.eup %1893  ;;  %v1320_v38 = vmul.f32 1.442695, %v1270_v30  ;;  %1370 = vadd.xlane.f32.xlu1 %v2408_v37 }
 0x356   : > { %v1322_v8 = vmul.f32 1.442695, %v1271_v9  ;;  %1364 = vadd.xlane.f32.xlu0 %v2411_v34  ;;  %v1221_v36 = vpop.xlane.xlu0 %1220  ;;  %v2416_v40 = vpop.eup %1895 }
 0x357   : > { %1905 = vpow2.f32 %v1320_v38  ;;  %v1268_v39 = vsub.f32 %v2309_v45, %v1221_v36  ;;  %v1223_v14 = vpop.xlane.xlu1 %1222 }
 0x358   : > { %v1269_v41 = vsub.f32 %v2312_v46, %v1223_v14  ;;  %1907 = vpow2.f32 %v1322_v8 }
 0x359   : > { %v2419_v15 = vpop.eup %1897  ;;  %v1316_v43 = vmul.f32 1.442695, %v1268_v39  ;;  %1366 = vadd.xlane.f32.xlu1 %v2416_v40 }
 0x35a   : > { %v1318_v44 = vmul.f32 1.442695, %v1269_v41  ;;  %1376 = vadd.xlane.f32.xlu0 %v2419_v15  ;;  %v1233_v17 = vpop.xlane.xlu0 %1232  ;;  %v2424_v45 = vpop.eup %1899 }
 0x35b   : > { %1909 = vpow2.f32 %v1316_v43  ;;  %v1274_v47 = vsub.f32 %v2316_v48, %v1233_v17  ;;  %v1235_v20 = vpop.xlane.xlu1 %1234 }
 0x35c   : > { %v1275_v50 = vsub.f32 %v2320_v51, %v1235_v20  ;;  %1911 = vpow2.f32 %v1318_v44 }
 0x35d   : > { %v2427_v11 = vpop.eup %1901  ;;  %v1328_v46 = vmul.f32 1.442695, %v1274_v47  ;;  %1378 = vadd.xlane.f32.xlu1 %v2424_v45 }
 0x35e   : > { %v1330_v55 = vmul.f32 1.442695, %v1275_v50  ;;  %1372 = vadd.xlane.f32.xlu0 %v2427_v11  ;;  %v1229_v21 = vpop.xlane.xlu0 %1228  ;;  %v2432_v48 = vpop.eup %1903 }
 0x35f   : > { %1913 = vpow2.f32 %v1328_v46  ;;  %v1272_v57 = vsub.f32 %v2325_v53, %v1229_v21  ;;  %v1231_v58 = vpop.xlane.xlu1 %1230 }
 0x360   : > { %v1273_v60 = vsub.f32 %v2328_v54, %v1231_v58  ;;  %1915 = vpow2.f32 %v1330_v55 }
 0x361   : > { %v2435_v23 = vpop.eup %1905  ;;  %v1324_v51 = vmul.f32 1.442695, %v1272_v57  ;;  %1374 = vadd.xlane.f32.xlu1 %v2432_v48 }
 0x362   : > { %v1326_v2 = vmul.f32 1.442695, %v1273_v60  ;;  %1384 = vadd.xlane.f32.xlu0 %v2435_v23  ;;  %v1241_v26 = vpop.xlane.xlu0 %1240  ;;  %v2440_v53 = vpop.eup %1907 }
 0x363   : > { %1917 = vpow2.f32 %v1324_v51  ;;  %v1278_v3 = vsub.f32 %v2332_v56, %v1241_v26  ;;  %v1243_v10 = vpop.xlane.xlu1 %1242 }
 0x364   : > { %v1279_v12 = vsub.f32 %v2336_v59, %v1243_v10  ;;  %1919 = vpow2.f32 %v1326_v2 }
 0x365   : > { %v2443_v13 = vpop.eup %1909  ;;  %v1336_v54 = vmul.f32 1.442695, %v1278_v3  ;;  %1386 = vadd.xlane.f32.xlu1 %v2440_v53 }
 0x366   : > { %v1338_v29 = vmul.f32 1.442695, %v1279_v12  ;;  %1380 = vadd.xlane.f32.xlu0 %v2443_v13  ;;  %v1237_v18 = vpop.xlane.xlu0 %1236  ;;  %v2448_v56 = vpop.eup %1911 }
 0x367   : > { %1921 = vpow2.f32 %v1336_v54  ;;  %v1276_v19 = vsub.f32 %v2341_v61, %v1237_v18  ;;  %v1239_v32 = vpop.xlane.xlu1 %1238 }
 0x368   : > { %v1277_v22 = vsub.f32 %v2344_v62, %v1239_v32  ;;  %1923 = vpow2.f32 %v1338_v29 }
 0x369   : > { %v2451_v24 = vpop.eup %1913  ;;  %v1332_v59 = vmul.f32 1.442695, %v1276_v19  ;;  %1382 = vadd.xlane.f32.xlu1 %v2448_v56 }
 0x36a   : > { %v1334_v35 = vmul.f32 1.442695, %v1277_v22  ;;  %1392 = vadd.xlane.f32.xlu0 %v2451_v24  ;;  %v1245_v25 = vpop.xlane.xlu0 %1244  ;;  %v2456_v30 = vpop.eup %1915 }
 0x36b   : > { %1925 = vpow2.f32 %v1332_v59  ;;  %v1280_v27 = vsub.f32 %v2349_v1, %v1245_v25 }
 0x36c   : > { %v1247_v61 = vpop.xlane.xlu1 %1246  ;;  %1927 = vpow2.f32 %v1334_v35 }
 0x36d   : > { %v2458_v33 = vpop.eup %1917  ;;  %v1340_v9 = vmul.f32 1.442695, %v1280_v27  ;;  %v1281_v62 = vsub.f32 %v2352_v4, %v1247_v61  ;;  %1394 = vadd.xlane.f32.xlu1 %v2456_v30 }
 0x36e   : > { %1388 = vadd.xlane.f32.xlu0 %v2458_v33  ;;  %v1249_v38 = vpop.xlane.xlu0 %1248  ;;  %v2464_v39 = vpop.eup %1919 }
 0x36f   : > { %1929 = vpow2.f32 %v1340_v9  ;;  %v1342_v8 = vmul.f32 1.442695, %v1281_v62  ;;  %v1282_v36 = vsub.f32 %v2356_v5, %v1249_v38 }
 0x370   : > { %v1251_v1 = vpop.xlane.xlu1 %1250 }
 0x371   : > { %v2466_v14 = vpop.eup %1921  ;;  %1931 = vpow2.f32 %v1342_v8  ;;  %v1344_v41 = vmul.f32 1.442695, %v1282_v36  ;;  %v1283_v43 = vsub.f32 %v2360_v7, %v1251_v1  ;;  %1390 = vadd.xlane.f32.xlu1 %v2464_v39 }
 0x372   : > { %1400 = vadd.xlane.f32.xlu0 %v2466_v14  ;;  %v2471_v44 = vpop.eup %1923 }
 0x373   : > { %1933 = vpow2.f32 %v1344_v41  ;;  %v1346_v4 = vmul.f32 1.442695, %v1283_v43 }
 0x375   : > { %v2473_v17 = vpop.eup %1925  ;;  %1935 = vpow2.f32 %v1346_v4  ;;  %1402 = vadd.xlane.f32.xlu1 %v2471_v44 }
 0x376   : > { %1396 = vadd.xlane.f32.xlu0 %v2473_v17  ;;  %v2477_v5 = vpop.eup %1927 }
 0x379   : > { %v2479_v47 = vpop.eup %1929  ;;  %1398 = vadd.xlane.f32.xlu1 %v2477_v5 }
 0x37a   : > { %1404 = vadd.xlane.f32.xlu0 %v2479_v47 }
 0x37b   : > { %v2483_v7 = vpop.eup %1931 }
 0x37d   : > { %v2485_v20 = vpop.eup %1933  ;;  %1406 = vadd.xlane.f32.xlu1 %v2483_v7 }
 0x37e   : > { %1408 = vadd.xlane.f32.xlu0 %v2485_v20 }
 0x37f   : > { %v2489_v50 = vpop.eup %1935 }
 0x381   : > { %1410 = vadd.xlane.f32.xlu1 %v2489_v50 }
 0x3ce   : > { %v1353_v46 = vpop.xlane.xlu0 %1352 }
 0x3cf   : > { %1937 = vrcp.f32 %v1353_v46 }
 0x3d2   : > { %v1355_v55 = vpop.xlane.xlu1 %1354  ;;  %v1349_v21 = vpop.xlane.xlu0 %1348 }
 0x3d3   : > { %1939 = vrcp.f32 %v1355_v55 }
 0x3d4   : > { %1941 = vrcp.f32 %v1349_v21 }
 0x3d6   : > { %v1351_v57 = vpop.xlane.xlu1 %1350 }
 0x3d7   : > { %1943 = vrcp.f32 %v1351_v57  ;;  %v1361_v58 = vpop.xlane.xlu0 %1360 }
 0x3d8   : > { %1945 = vrcp.f32 %v1361_v58 }
 0x3d9   : > { %v1938_v60 = vpop.eup %1937 }
 0x3da   : > { %v1446_v51 = vmul.f32 %v1938_v60, %v2371_v42  ;;  %v1363_v2 = vpop.xlane.xlu1 %1362 }
 0x3db   : > { %1947 = vrcp.f32 %v1363_v2  ;;  %v1357_v26 = vpop.xlane.xlu0 %1356 }
 0x3dc   : > { %1479 = vst.msk [vmem:[%s2496_s11 + $0x10] sm:$0xff] %vm1476_vm1, %v1446_v51  ;;  %1949 = vrcp.f32 %v1357_v26 }
 0x3dd   : > { %v1940_v3 = vpop.eup %1939 }
 0x3de   : > { %v1942_v10 = vpop.eup %1941  ;;  %v1447_v12 = vmul.f32 %v1940_v3, %v2378_v52  ;;  %v1359_v54 = vpop.xlane.xlu1 %1358 }
 0x3df   : > { %v1444_v29 = vmul.f32 %v1942_v10, %v2375_v49  ;;  %1951 = vrcp.f32 %v1359_v54  ;;  %v1369_v18 = vpop.xlane.xlu0 %1368 }
 0x3e0   : > { %1480 = vst.msk [vmem:[%s2496_s11 + $0x18] sm:$0xff] %vm1476_vm1, %v1447_v12  ;;  %1953 = vrcp.f32 %v1369_v18 }
 0x3e1   : > { %v1944_v42 = vpop.eup %1943  ;;  %1477 = vst.msk [vmem:[%s2496_s11] sm:$0xff] %vm1476_vm1, %v1444_v29 }
 0x3e2   : > { %v1946_v19 = vpop.eup %1945  ;;  %v1445_v32 = vmul.f32 %v1944_v42, %v2384_v63  ;;  %v1371_v22 = vpop.xlane.xlu1 %1370 }
 0x3e3   : > { %v1450_v59 = vmul.f32 %v1946_v19, %v2387_v0  ;;  %1955 = vrcp.f32 %v1371_v22  ;;  %v1365_v52 = vpop.xlane.xlu0 %1364 }
 0x3e4   : > { %1478 = vst.msk [vmem:[%s2496_s11 + $0x8] sm:$0xff] %vm1476_vm1, %v1445_v32  ;;  %1957 = vrcp.f32 %v1365_v52 }
 0x3e5   : > { %v1948_v49 = vpop.eup %1947  ;;  %1483 = vst.msk [vmem:[%s2496_s11 + $0x30] sm:$0xff] %vm1476_vm1, %v1450_v59 }
 0x3e6   : > { %v1950_v35 = vpop.eup %1949  ;;  %v1451_v25 = vmul.f32 %v1948_v49, %v2392_v28  ;;  %v1367_v27 = vpop.xlane.xlu1 %1366 }
 0x3e7   : > { %v1448_v61 = vmul.f32 %v1950_v35, %v2395_v16  ;;  %1959 = vrcp.f32 %v1367_v27  ;;  %v1377_v63 = vpop.xlane.xlu0 %1376 }
 0x3e8   : > { %1484 = vst.msk [vmem:[%s2496_s11 + $0x38] sm:$0xff] %vm1476_vm1, %v1451_v25  ;;  %1961 = vrcp.f32 %v1377_v63 }
 0x3e9   : > { %v1952_v0 = vpop.eup %1951  ;;  %1481 = vst.msk [vmem:[%s2496_s11 + $0x20] sm:$0xff] %vm1476_vm1, %v1448_v61 }
 0x3ea   : > { %v1954_v9 = vpop.eup %1953  ;;  %v1449_v62 = vmul.f32 %v1952_v0, %v2400_v31  ;;  %v1379_v38 = vpop.xlane.xlu1 %1378 }
 0x3eb   : > { %v1454_v8 = vmul.f32 %v1954_v9, %v2403_v6  ;;  %1963 = vrcp.f32 %v1379_v38  ;;  %v1373_v28 = vpop.xlane.xlu0 %1372 }
 0x3ec   : > { %1482 = vst.msk [vmem:[%s2496_s11 + $0x28] sm:$0xff] %vm1476_vm1, %v1449_v62  ;;  %1965 = vrcp.f32 %v1373_v28 }
 0x3ed   : > { %v1956_v16 = vpop.eup %1955  ;;  %1487 = vst.msk [vmem:[%s2496_s11 + $0x50] sm:$0xff] %vm1476_vm1, %v1454_v8 }
 0x3ee   : > { %v1958_v36 = vpop.eup %1957  ;;  %v1455_v1 = vmul.f32 %v1956_v16, %v2408_v37  ;;  %v1375_v41 = vpop.xlane.xlu1 %1374 }
 0x3ef   : > { %v1452_v43 = vmul.f32 %v1958_v36, %v2411_v34  ;;  %1967 = vrcp.f32 %v1375_v41  ;;  %v1385_v31 = vpop.xlane.xlu0 %1384 }
 0x3f0   : > { %1488 = vst.msk [vmem:[%s2496_s11 + $0x58] sm:$0xff] %vm1476_vm1, %v1455_v1  ;;  %1969 = vrcp.f32 %v1385_v31 }
 0x3f1   : > { %v1960_v6 = vpop.eup %1959  ;;  %1485 = vst.msk [vmem:[%s2496_s11 + $0x40] sm:$0xff] %vm1476_vm1, %v1452_v43 }
 0x3f2   : > { %v1962_v4 = vpop.eup %1961  ;;  %v1453_v46 = vmul.f32 %v1960_v6, %v2416_v40  ;;  %v1387_v55 = vpop.xlane.xlu1 %1386 }
 0x3f3   : > { %v1458_v21 = vmul.f32 %v1962_v4, %v2419_v15  ;;  %1971 = vrcp.f32 %v1387_v55  ;;  %v1381_v37 = vpop.xlane.xlu0 %1380 }
 0x3f4   : > { %1486 = vst.msk [vmem:[%s2496_s11 + $0x48] sm:$0xff] %vm1476_vm1, %v1453_v46  ;;  %1973 = vrcp.f32 %v1381_v37 }
 0x3f5   : > { %v1964_v34 = vpop.eup %1963  ;;  %1491 = vst.msk [vmem:[%s2496_s11 + $0x70] sm:$0xff] %vm1476_vm1, %v1458_v21 }
 0x3f6   : > { %v1966_v57 = vpop.eup %1965  ;;  %v1459_v58 = vmul.f32 %v1964_v34, %v2424_v45  ;;  %v1383_v60 = vpop.xlane.xlu1 %1382 }
 0x3f7   : > { %v1456_v51 = vmul.f32 %v1966_v57, %v2427_v11  ;;  %1975 = vrcp.f32 %v1383_v60  ;;  %v1393_v40 = vpop.xlane.xlu0 %1392 }
 0x3f8   : > { %1492 = vst.msk [vmem:[%s2496_s11 + $0x78] sm:$0xff] %vm1476_vm1, %v1459_v58  ;;  %1977 = vrcp.f32 %v1393_v40 }
 0x3f9   : > { %v1968_v15 = vpop.eup %1967  ;;  %1489 = vst.msk [vmem:[%s2496_s11 + $0x60] sm:$0xff] %vm1476_vm1, %v1456_v51 }
 0x3fa   : > { %v1970_v2 = vpop.eup %1969  ;;  %v1457_v26 = vmul.f32 %v1968_v15, %v2432_v48  ;;  %v1395_v3 = vpop.xlane.xlu1 %1394 }
 0x3fb   : > { %v1462_v10 = vmul.f32 %v1970_v2, %v2435_v23  ;;  %1979 = vrcp.f32 %v1395_v3  ;;  %v1389_v45 = vpop.xlane.xlu0 %1388 }
 0x3fc   : > { %1490 = vst.msk [vmem:[%s2496_s11 + $0x68] sm:$0xff] %vm1476_vm1, %v1457_v26  ;;  %1981 = vrcp.f32 %v1389_v45 }
 0x3fd   : > { %v1972_v11 = vpop.eup %1971  ;;  %1495 = vst.msk [vmem:[%s2496_s11 + $0x90] sm:$0xff] %vm1476_vm1, %v1462_v10 }
 0x3fe   : > { %v1974_v12 = vpop.eup %1973  ;;  %v1463_v54 = vmul.f32 %v1972_v11, %v2440_v53  ;;  %v1391_v29 = vpop.xlane.xlu1 %1390 }
 0x3ff   : > { %v1460_v18 = vmul.f32 %v1974_v12, %v2443_v13  ;;  %1983 = vrcp.f32 %v1391_v29  ;;  %v1401_v48 = vpop.xlane.xlu0 %1400 }
 0x400   : > { %1496 = vst.msk [vmem:[%s2496_s11 + $0x98] sm:$0xff] %vm1476_vm1, %v1463_v54  ;;  %1985 = vrcp.f32 %v1401_v48 }
 0x401   : > { %v1976_v23 = vpop.eup %1975  ;;  %1493 = vst.msk [vmem:[%s2496_s11 + $0x80] sm:$0xff] %vm1476_vm1, %v1460_v18 }
 0x402   : > { %v1978_v42 = vpop.eup %1977  ;;  %v1461_v19 = vmul.f32 %v1976_v23, %v2448_v56  ;;  %v1403_v32 = vpop.xlane.xlu1 %1402 }
 0x403   : > { %v1466_v22 = vmul.f32 %v1978_v42, %v2451_v24  ;;  %1987 = vrcp.f32 %v1403_v32  ;;  %v1397_v53 = vpop.xlane.xlu0 %1396 }
 0x404   : > { %1494 = vst.msk [vmem:[%s2496_s11 + $0x88] sm:$0xff] %vm1476_vm1, %v1461_v19  ;;  %1989 = vrcp.f32 %v1397_v53 }
 0x405   : > { %v1980_v13 = vpop.eup %1979  ;;  %1499 = vst.msk [vmem:[%s2496_s11 + $0xb0] sm:$0xff] %vm1476_vm1, %v1466_v22 }
 0x406   : > { %v1982_v59 = vpop.eup %1981  ;;  %v1467_v52 = vmul.f32 %v1980_v13, %v2456_v30  ;;  %v1399_v49 = vpop.xlane.xlu1 %1398 }
 0x407   : > { %v1464_v35 = vmul.f32 %v1982_v59, %v2458_v33  ;;  %1991 = vrcp.f32 %v1399_v49  ;;  %v1405_v56 = vpop.xlane.xlu0 %1404 }
 0x408   : > { %1500 = vst.msk [vmem:[%s2496_s11 + $0xb8] sm:$0xff] %vm1476_vm1, %v1467_v52  ;;  %1993 = vrcp.f32 %v1405_v56 }
 0x409   : > { %v1984_v24 = vpop.eup %1983  ;;  %1497 = vst.msk [vmem:[%s2496_s11 + $0xa0] sm:$0xff] %vm1476_vm1, %v1464_v35 }
 0x40a   : > { %v1986_v25 = vpop.eup %1985  ;;  %v1465_v27 = vmul.f32 %v1984_v24, %v2464_v39  ;;  %v1407_v61 = vpop.xlane.xlu1 %1406 }
 0x40b   : > { %v1470_v30 = vmul.f32 %v1986_v25, %v2466_v14  ;;  %1995 = vrcp.f32 %v1407_v61  ;;  %v1409_v63 = vpop.xlane.xlu0 %1408 }
 0x40c   : > { %1498 = vst.msk [vmem:[%s2496_s11 + $0xa8] sm:$0xff] %vm1476_vm1, %v1465_v27  ;;  %1997 = vrcp.f32 %v1409_v63 }
 0x40d   : > { %v1988_v33 = vpop.eup %1987  ;;  %1503 = vst.msk [vmem:[%s2496_s11 + $0xd0] sm:$0xff] %vm1476_vm1, %v1470_v30 }
 0x40e   : > { %v1990_v0 = vpop.eup %1989  ;;  %v1471_v9 = vmul.f32 %v1988_v33, %v2471_v44  ;;  %v1411_v62 = vpop.xlane.xlu1 %1410 }
 0x40f   : > { %v1468_v39 = vmul.f32 %v1990_v0, %v2473_v17  ;;  %1999 = vrcp.f32 %v1411_v62 }
 0x410   : > { %1504 = vst.msk [vmem:[%s2496_s11 + $0xd8] sm:$0xff] %vm1476_vm1, %v1471_v9 }
 0x411   : > { %v1992_v14 = vpop.eup %1991  ;;  %1501 = vst.msk [vmem:[%s2496_s11 + $0xc0] sm:$0xff] %vm1476_vm1, %v1468_v39 }
 0x412   : > { %v1994_v38 = vpop.eup %1993  ;;  %v1469_v8 = vmul.f32 %v1992_v14, %v2477_v5 }
 0x413   : > { %v1472_v28 = vmul.f32 %v1994_v38, %v2479_v47 }
 0x414   : > { %1502 = vst.msk [vmem:[%s2496_s11 + $0xc8] sm:$0xff] %vm1476_vm1, %v1469_v8 }
 0x415   : > { %v1996_v44 = vpop.eup %1995  ;;  %1505 = vst.msk [vmem:[%s2496_s11 + $0xe0] sm:$0xff] %vm1476_vm1, %v1472_v28 }
 0x416   : > { %v1998_v16 = vpop.eup %1997  ;;  %v1473_v17 = vmul.f32 %v1996_v44, %v2483_v7 }
 0x417   : > { %v1474_v36 = vmul.f32 %v1998_v16, %v2485_v20 }
 0x418   : > { %1506 = vst.msk [vmem:[%s2496_s11 + $0xe8] sm:$0xff] %vm1476_vm1, %v1473_v17 }
 0x419   : > { %v2000_v1 = vpop.eup %1999  ;;  %1507 = vst.msk [vmem:[%s2496_s11 + $0xf0] sm:$0xff] %vm1476_vm1, %v1474_v36 }
 0x41a   : > { %v1475_v41 = vmul.f32 %v2000_v1, %v2489_v50 }
 0x41c   : > { %1508 = vst.msk [vmem:[%s2496_s11 + $0xf8] sm:$0xff] %vm1476_vm1, %v1475_v41 }
 0x41d PF: > { %s17_s24 = sadd.s32 1, %s2007_s24  }
 0x41e   : > { %p14_p4 = scmp.ge.s32.totalorder %s17_s24, 4  }
 0x420   :  { %16 = sbr.rel (!%p14_p4) target bundleno = 1 (0x1), region = 78 }

</bundles_post_ra>
